<compile_context>
chip_gen: v7x
topology: tpu7x:2x2x1
jax: 0.10.0
libtpu: 0.0.40
codegen_flags: <defaults>
</compile_context>

<pallas_src>
import jax
import jax.numpy as jnp
from jax.experimental import pallas as pl
from jax.experimental.pallas import tpu as pltpu


# ----------------------------------------------------------------------------
# Fused path: all layers inside one grid-less kernel (everything VMEM-resident)
# ----------------------------------------------------------------------------
def _make_fused_kernel(num_layers):
    def kernel(a_ref, x_ref, *refs):
        o_ref = refs[-1]
        wb_refs = refs[:-1]
        a = a_ref[...]
        h = x_ref[...]
        for l in range(num_layers):
            w = wb_refs[2 * l][...]
            b = wb_refs[2 * l + 1][...]
            xw = jnp.dot(h, w, preferred_element_type=jnp.float32)              # MXU
            h = jnp.maximum(jnp.dot(a, xw, preferred_element_type=jnp.float32)  # MXU
                            + b, 0.0)                                            # VPU epilogue
        o_ref[...] = h.astype(o_ref.dtype)

    return kernel


def gcn_body_forward_fused(params, x, a_hat):
    """All GCN layers in a single kernel: only the final H touches HBM."""
    n = a_hat.shape[0]
    f_out = params[-1][0].shape[1]
    args = [a_hat.astype(jnp.float32), x.astype(jnp.float32)]
    for w, b in params:
        args.append(w.astype(jnp.float32))
        args.append(b.reshape(1, -1).astype(jnp.float32))
    vmem = pl.BlockSpec(memory_space=pltpu.MemorySpace.VMEM)
    return pl.pallas_call(
        _make_fused_kernel(len(params)),
        out_shape=jax.ShapeDtypeStruct((n, f_out), jnp.float32),
        in_specs=[vmem] * len(args),
        out_specs=vmem,
    )(*args)


# ----------------------------------------------------------------------------
# Tiled path: hoisted X @ W (computed once) + bf16 A_hat row-stripe streaming
# ----------------------------------------------------------------------------
def _xw_kernel(x_ref, w_ref, o_ref):
    # bf16 operands, f32 accumulate; output stored as bf16 for the A-matmul.
    xw = jnp.dot(x_ref[...].astype(jnp.bfloat16),
                 w_ref[...].astype(jnp.bfloat16),
                 preferred_element_type=jnp.float32)
    o_ref[...] = xw.astype(o_ref.dtype)


def _compute_xw(x, w, *, tile_n):
    n, f_in = x.shape
    f_out = w.shape[1]
    return pl.pallas_call(
        _xw_kernel,
        out_shape=jax.ShapeDtypeStruct((n, f_out), jnp.bfloat16),
        grid_spec=pltpu.PrefetchScalarGridSpec(
            num_scalar_prefetch=0,
            grid=(n // tile_n,),
            in_specs=[
                pl.BlockSpec((tile_n, f_in), lambda i: (i, 0)),   # X row tile
                pl.BlockSpec((f_in, f_out), lambda i: (0, 0)),    # full W
            ],
            out_specs=pl.BlockSpec((tile_n, f_out), lambda i: (i, 0)),
        ),
        compiler_params=pltpu.CompilerParams(dimension_semantics=("parallel",)),
    )(x, w)


def _aggregate_relu_kernel(a_ref, xw_ref, b_ref, o_ref):
    # bf16 x bf16 on the MXU, f32 accumulate; bias + ReLU epilogue stays in f32
    # (VPU has no bf16 on v5e, so keep elementwise math in f32 on all chips).
    h = jnp.dot(a_ref[...], xw_ref[...], preferred_element_type=jnp.float32)
    o_ref[...] = jnp.maximum(h + b_ref[...], 0.0).astype(o_ref.dtype)


def gcn_conv_relu_tiled(a_hat_bf16, x, w, b, *, tile_n):
    """One GCNConv layer + ReLU: relu(A_hat @ (x @ w) + b), XW hoisted out of the grid."""
    n = a_hat_bf16.shape[0]
    f_out = w.shape[1]
    xw = _compute_xw(x.astype(jnp.float32), w.astype(jnp.float32), tile_n=tile_n)
    b2 = b.reshape(1, f_out).astype(jnp.float32)
    return pl.pallas_call(
        _aggregate_relu_kernel,
        out_shape=jax.ShapeDtypeStruct((n, f_out), jnp.float32),
        grid_spec=pltpu.PrefetchScalarGridSpec(
            num_scalar_prefetch=0,
            grid=(n // tile_n,),
            in_specs=[
                pl.BlockSpec((tile_n, n), lambda i: (i, 0)),   # bf16 A_hat row stripe (streamed)
                pl.BlockSpec((n, f_out), lambda i: (0, 0)),    # bf16 XW (grid-invariant)
                pl.BlockSpec((1, f_out), lambda i: (0, 0)),    # f32 bias
            ],
            out_specs=pl.BlockSpec((tile_n, f_out), lambda i: (i, 0)),
        ),
        compiler_params=pltpu.CompilerParams(dimension_semantics=("parallel",)),
    )(a_hat_bf16, xw, b2)


def gcn_body_forward_tiled(params, x, a_hat, *, tile_n=256):
    n = a_hat.shape[0]
    tile_n = min(tile_n, n)
    assert n % tile_n == 0 and tile_n % 8 == 0
    a_bf16 = a_hat.astype(jnp.bfloat16)   # quantize the dense adjacency ONCE per forward
    h = x.astype(jnp.float32)
    for w, b in params:
        h = gcn_conv_relu_tiled(a_bf16, h, w, b, tile_n=tile_n)
    # F.dropout in eval mode (training=False) is the identity.
    return h


def gcn_body_forward(params, x, a_hat, *, tile_n=256):
    """Dispatch: fully VMEM-resident fused kernel for small graphs, tiled otherwise."""
    n = a_hat.shape[0]
    f_max = max(max(w.shape) for w, _ in params)
    fused_bytes = 4 * (n * n + n * x.shape[1] + 2 * n * f_max +
                       sum(w.size + b.size for w, b in params))
    if fused_bytes <= (24 << 20):   # headroom under the ~32 MiB default scoped VMEM
        return gcn_body_forward_fused(params, x, a_hat)
    return gcn_body_forward_tiled(params, x, a_hat, tile_n=tile_n)


# ----------------------------------------------------------------------------
# Graph / parameter construction + pure-JAX reference
# ----------------------------------------------------------------------------
def build_normalized_adjacency(edge_index, num_nodes, edge_weight=None):
    """Dense GCN-normalized adjacency with self-loops (matches PyG gcn_norm)."""
    src = edge_index[0]
    dst = edge_index[1]
    if edge_weight is None:
        edge_weight = jnp.ones(src.shape[0], dtype=jnp.float32)
    loop = jnp.arange(num_nodes, dtype=src.dtype)
    src = jnp.concatenate([src, loop])
    dst = jnp.concatenate([dst, loop])
    edge_weight = jnp.concatenate([edge_weight, jnp.ones(num_nodes, jnp.float32)])
    deg = jnp.zeros((num_nodes,), jnp.float32).at[dst].add(edge_weight)
    dinv = jnp.where(deg > 0, 1.0 / jnp.sqrt(deg), 0.0)
    norm = dinv[dst] * edge_weight * dinv[src]
    # message src -> dst, aggregated at dst:  out = A_hat @ x  with A_hat[dst, src] = norm
    a = jnp.zeros((num_nodes, num_nodes), jnp.float32).at[dst, src].add(norm)
    return a


def init_gcn_body_params(key, nfeat, nhid, layer=2):
    """Deterministic glorot-uniform weights + zero bias for each GCNConv."""
    dims = [(nfeat, nhid)] + [(nhid, nhid)] * (layer - 1)
    params = []
    keys = jax.random.split(key, len(dims))
    for k, (fi, fo) in zip(keys, dims):
        limit = jnp.sqrt(6.0 / (fi + fo))
        w = jax.random.uniform(k, (fi, fo), jnp.float32, -limit, limit)
        b = jnp.zeros((fo,), jnp.float32)
        params.append((w, b))
    return params


def gcn_body_reference(params, x, a_hat):
    h = x
    for w, b in params:
        h = jnp.maximum(a_hat @ (h @ w) + b[None, :], 0.0)
    return h


if __name__ == "__main__":
    key = jax.random.PRNGKey(0)
    k_x, k_e, k_p, k_x2, k_e2, k_p2 = jax.random.split(key, 6)

    # --- small demo shape: fused single-kernel (all-f32, VMEM-resident) path ---
    N, NFEAT, NHID, E, LAYER = 128, 64, 32, 512, 2
    x = jax.random.normal(k_x, (N, NFEAT), jnp.float32)
    edge_index = jax.random.randint(k_e, (2, E), 0, N, dtype=jnp.int32)
    a_hat = build_normalized_adjacency(edge_index, N)
    params = init_gcn_body_params(k_p, NFEAT, NHID, layer=LAYER)

    out = jax.block_until_ready(gcn_body_forward(params, x, a_hat))
    ref = gcn_body_reference(params, x, a_hat)
    assert out.shape == (N, NHID)
    assert jnp.allclose(out, ref, atol=1e-3, rtol=1e-3), "fused path mismatch vs reference"

    # --- medium shape: tiled path (hoisted XW, bf16 A_hat streaming, tile_n=256) ---
    N2, NFEAT2, NHID2, E2 = 512, 128, 128, 4096
    x2 = jax.random.normal(k_x2, (N2, NFEAT2), jnp.float32)
    edge_index2 = jax.random.randint(k_e2, (2, E2), 0, N2, dtype=jnp.int32)
    a_hat2 = build_normalized_adjacency(edge_index2, N2)
    params2 = init_gcn_body_params(k_p2, NFEAT2, NHID2, layer=LAYER)

    out2 = jax.block_until_ready(gcn_body_forward_tiled(params2, x2, a_hat2, tile_n=256))
    ref2 = gcn_body_reference(params2, x2, a_hat2)
    rel_err = jnp.linalg.norm(out2 - ref2) / (jnp.linalg.norm(ref2) + 1e-6)
    assert out2.shape == (N2, NHID2)
    assert rel_err < 3e-2, f"tiled (bf16) path mismatch vs reference: rel err {rel_err}"

    print("KERNEL_OK")
</pallas_src>

<mosaic_0001>
module attributes {stable_mosaic.version = 11 : i64} {
  func.func @kernel(%arg0: memref<128x128xf32, #tpu.memory_space<vmem>>, %arg1: memref<128x64xf32, #tpu.memory_space<vmem>>, %arg2: memref<64x32xf32, #tpu.memory_space<vmem>>, %arg3: memref<1x32xf32, #tpu.memory_space<vmem>>, %arg4: memref<32x32xf32, #tpu.memory_space<vmem>>, %arg5: memref<1x32xf32, #tpu.memory_space<vmem>>, %arg6: memref<128x32xf32, #tpu.memory_space<vmem>>) attributes {dimension_semantics = [], scalar_prefetch = 0 : i64, scratch_operands = 0 : i64, tpu.core_type = #tpu.core_type<tc>} {
    %c0 = arith.constant 0 : index
    %c0_0 = arith.constant 0 : index
    %0 = vector.load %arg0[%c0, %c0_0] : memref<128x128xf32, #tpu.memory_space<vmem>>, vector<128x128xf32>
    %c0_1 = arith.constant 0 : index
    %c0_2 = arith.constant 0 : index
    %1 = vector.load %arg1[%c0_1, %c0_2] : memref<128x64xf32, #tpu.memory_space<vmem>>, vector<128x64xf32>
    %c0_3 = arith.constant 0 : index
    %c0_4 = arith.constant 0 : index
    %2 = vector.load %arg2[%c0_3, %c0_4] : memref<64x32xf32, #tpu.memory_space<vmem>>, vector<64x32xf32>
    %c0_5 = arith.constant 0 : index
    %c0_6 = arith.constant 0 : index
    %3 = vector.load %arg3[%c0_5, %c0_6] : memref<1x32xf32, #tpu.memory_space<vmem>>, vector<1x32xf32>
    %cst = arith.constant dense<0.000000e+00> : vector<128x32xf32>
    %4 = tpu.matmul %1, %2, %cst {dimension_numbers = #tpu.dot_dimension_numbers<[1], [0], [0], [1], [0, 0, 1, 1], [], []>} : vector<128x64xf32>, vector<64x32xf32>, vector<128x32xf32> -> vector<128x32xf32>
    %cst_7 = arith.constant dense<0.000000e+00> : vector<128x32xf32>
    %5 = tpu.matmul %0, %4, %cst_7 {dimension_numbers = #tpu.dot_dimension_numbers<[1], [0], [0], [1], [0, 0, 1, 1], [], []>} : vector<128x128xf32>, vector<128x32xf32>, vector<128x32xf32> -> vector<128x32xf32>
    %6 = vector.broadcast %3 : vector<1x32xf32> to vector<128x32xf32>
    %7 = arith.addf %5, %6 : vector<128x32xf32>
    %cst_8 = arith.constant 0.000000e+00 : f32
    %8 = vector.broadcast %cst_8 : f32 to vector<128x32xf32>
    %9 = arith.maximumf %7, %8 : vector<128x32xf32>
    %c0_9 = arith.constant 0 : index
    %c0_10 = arith.constant 0 : index
    %10 = vector.load %arg4[%c0_9, %c0_10] : memref<32x32xf32, #tpu.memory_space<vmem>>, vector<32x32xf32>
    %c0_11 = arith.constant 0 : index
    %c0_12 = arith.constant 0 : index
    %11 = vector.load %arg5[%c0_11, %c0_12] : memref<1x32xf32, #tpu.memory_space<vmem>>, vector<1x32xf32>
    %cst_13 = arith.constant dense<0.000000e+00> : vector<128x32xf32>
    %12 = tpu.matmul %9, %10, %cst_13 {dimension_numbers = #tpu.dot_dimension_numbers<[1], [0], [0], [1], [0, 0, 1, 1], [], []>} : vector<128x32xf32>, vector<32x32xf32>, vector<128x32xf32> -> vector<128x32xf32>
    %cst_14 = arith.constant dense<0.000000e+00> : vector<128x32xf32>
    %13 = tpu.matmul %0, %12, %cst_14 {dimension_numbers = #tpu.dot_dimension_numbers<[1], [0], [0], [1], [0, 0, 1, 1], [], []>} : vector<128x128xf32>, vector<128x32xf32>, vector<128x32xf32> -> vector<128x32xf32>
    %14 = vector.broadcast %11 : vector<1x32xf32> to vector<128x32xf32>
    %15 = arith.addf %13, %14 : vector<128x32xf32>
    %cst_15 = arith.constant 0.000000e+00 : f32
    %16 = vector.broadcast %cst_15 : f32 to vector<128x32xf32>
    %17 = arith.maximumf %15, %16 : vector<128x32xf32>
    %c0_16 = arith.constant 0 : index
    %c0_17 = arith.constant 0 : index
    %18 = vector.load %arg6[%c0_16, %c0_17] : memref<128x32xf32, #tpu.memory_space<vmem>>, vector<128x32xf32>
    tpu.vector_store %arg6[%c0_16, %c0_17], %17 {strides = array<i32>} : memref<128x32xf32, #tpu.memory_space<vmem>>, vector<128x32xf32>,
    return
  }
}

</mosaic_0001>

<bundles_post_ra>
// kernel: tpu_custom_call.1
= control target key start
LH: loop header
LB: loop body
LE: loop exit
PB: predicated region body
PF: predicated region fallthrough
CT: control target
= control target key end

     0   :  { %vm64_vm0 = vcmask 523264   ;;  %vm430_vm1 = vcmask 261120   ;;  %s1570_s2 = inlined_call_operand.vmem [shape: f32[64,32], index: 2, kind: input, shape index: {}]   ;;  %s1571_s1 = inlined_call_operand.vmem [shape: f32[128,64], index: 1, kind: input, shape index: {}]   ;;  %s1572_s0 = inlined_call_operand.vmem [shape: f32[128,128], index: 0, kind: input, shape index: {}]   ;;  %s1573_s4 = inlined_call_operand.vmem [shape: f32[32,32], index: 4, kind: input, shape index: {}]   ;;  %s1574_s3 = inlined_call_operand.vmem [shape: f32[1,32], index: 3, kind: input, shape index: {}]   ;;  %s1575_s5 = inlined_call_operand.vmem [shape: f32[1,32], index: 5, kind: input, shape index: {}]   ;;  %s1576_s6 = inlined_call_operand.vmem [shape: f32[128,32], index: 6, kind: output, shape index: {}]  }
   0x1   :  { %v55_v0 = vld [vmem:[%s1570_s2] sm:$0xff]  ;;  %v56_v1 = vld [vmem:[%s1570_s2 + $0x8] sm:$0xff]  ;;  %v57_v2 = vld [vmem:[%s1570_s2 + $0x10] sm:$0xff] }
   0x2   :  { %v1137_v3 = vpack.c.bf16 %v56_v1, %v55_v0  ;;  %v58_v4 = vld [vmem:[%s1570_s2 + $0x18] sm:$0xff]  ;;  %v59_v6 = vld [vmem:[%s1570_s2 + $0x20] sm:$0xff]  ;;  %v60_v7 = vld [vmem:[%s1570_s2 + $0x28] sm:$0xff] }
   0x3   :  { %v1141_v5 = vpack.c.bf16 %v58_v4, %v57_v2  ;;  %v39_v8 = vld [vmem:[%s1571_s1] sm:$0xff]  ;;  %v1145_v9 = vpack.c.bf16 %v60_v7, %v59_v6  ;;  %v61_v10 = vld [vmem:[%s1570_s2 + $0x30] sm:$0xff]  ;;  %v62_v11 = vld [vmem:[%s1570_s2 + $0x38] sm:$0xff] }
   0x4   :  { %1138 = vmatprep.subr.bf16.mxu0 %v1137_v3  ;;  %969 = vmatprep.mubr.msk.f32.mxu0 %vm64_vm0, %v39_v8  ;;  %v1149_v12 = vpack.c.bf16 %v62_v11, %v61_v10  ;;  %v40_v13 = vld [vmem:[%s1571_s1 + $0x8] sm:$0xff]  ;;  %v41_v14 = vld [vmem:[%s1571_s1 + $0x10] sm:$0xff]  ;;  %v42_v15 = vld [vmem:[%s1571_s1 + $0x18] sm:$0xff] }
   0x5   :  { %1140 = vmatpush3.bf16.msra.mxu0 %v1137_v3  ;;  %v43_v16 = vld [vmem:[%s1571_s1 + $0x20] sm:$0xff]  ;;  %v44_v17 = vld [vmem:[%s1571_s1 + $0x28] sm:$0xff]  ;;  %v45_v18 = vld [vmem:[%s1571_s1 + $0x30] sm:$0xff] }
   0x6   :  { %1142 = vmatprep.subr.bf16.mxu0 %v1141_v5  ;;  %v46_v19 = vld [vmem:[%s1571_s1 + $0x38] sm:$0xff]  ;;  %v47_v20 = vld [vmem:[%s1571_s1 + $0x40] sm:$0xff]  ;;  %v48_v21 = vld [vmem:[%s1571_s1 + $0x48] sm:$0xff] }
   0x7   :  { %v49_v22 = vld [vmem:[%s1571_s1 + $0x50] sm:$0xff]  ;;  %v50_v23 = vld [vmem:[%s1571_s1 + $0x58] sm:$0xff]  ;;  %v51_v24 = vld [vmem:[%s1571_s1 + $0x60] sm:$0xff] }
   0x8   :  { %v52_v25 = vld [vmem:[%s1571_s1 + $0x68] sm:$0xff]  ;;  %v53_v26 = vld [vmem:[%s1571_s1 + $0x70] sm:$0xff]  ;;  %v54_v27 = vld [vmem:[%s1571_s1 + $0x78] sm:$0xff] }
   0x9   :  { %1144 = vmatpush3.bf16.msra.mxu0 %v1141_v5  ;;  %v1367_v28 = vld [vmem:[%s1572_s0] sm:$0xff]  ;;  %v426_v30 = vld [vmem:[%s1573_s4 + $0x8] sm:$0xff]  ;;  %v427_v31 = vld [vmem:[%s1573_s4 + $0x10] sm:$0xff] }
   0xa   :  { %1146 = vmatprep.subr.bf16.mxu0 %v1145_v9  ;;  %1025 = vmatprep.mubr.f32.mxu1 %v1367_v28  ;;  %v425_v29 = vld [vmem:[%s1573_s4] sm:$0xff]  ;;  %v428_v33 = vld [vmem:[%s1573_s4 + $0x18] sm:$0xff]  ;;  %v1385_v59 = vld [vmem:[%s1572_s0 + $0x8] sm:$0xff] }
   0xb   :  { %v1185_v32 = vpack.c.bf16 %v426_v30, %v425_v29  ;;  %v1189_v34 = vpack.c.bf16 %v428_v33, %v427_v31  ;;  %v1390_v60 = vld [vmem:[%s1572_s0 + $0x10] sm:$0xff]  ;;  %v1397_v61 = vld [vmem:[%s1572_s0 + $0x18] sm:$0xff]  ;;  %v27_v62 = vld [vmem:[%s1572_s0 + $0x20] sm:$0xff] }
   0xc   :  { %v1406_v63 = vld [vmem:[%s1572_s0 + $0x28] sm:$0xff]  ;;  %v1411_v0 = vld [vmem:[%s1572_s0 + $0x30] sm:$0xff]  ;;  %v1418_v1 = vld [vmem:[%s1572_s0 + $0x38] sm:$0xff] }
   0xd   :  { %1148 = vmatpush3.bf16.msra.mxu0 %v1145_v9  ;;  %v1423_v2 = vld [vmem:[%s1572_s0 + $0x40] sm:$0xff]  ;;  %v1430_v3 = vld [vmem:[%s1572_s0 + $0x48] sm:$0xff]  ;;  %v1435_v4 = vld [vmem:[%s1572_s0 + $0x50] sm:$0xff] }
   0xe   :  { %1150 = vmatprep.subr.bf16.mxu0 %v1149_v12  ;;  %v1442_v5 = vld [vmem:[%s1572_s0 + $0x58] sm:$0xff]  ;;  %v1447_v6 = vld [vmem:[%s1572_s0 + $0x60] sm:$0xff]  ;;  %v1454_v7 = vld [vmem:[%s1572_s0 + $0x68] sm:$0xff] }
   0xf   :  { %v1459_v8 = vld [vmem:[%s1572_s0 + $0x70] sm:$0xff]  ;;  %v1466_v9 = vld [vmem:[%s1572_s0 + $0x78] sm:$0xff]  ;;  %v827_v10 = vld [vmem:[%s1574_s3] ss:$0 sm:$0xff] }
  0x11   :  { %1152 = vmatpush3.bf16.msra.mxu0 %v1149_v12 }
  0x12   :  { %1186 = vmatprep.subr.bf16.mxu0 %v1185_v32 }
  0x14   :  { %970 = vmatmul.mubr.msk.f32.vlgmr.msra.gmra.mrb[0].mxu0 %vm64_vm0, %v40_v13 }
  0x15   :  { %972 = vmatprep.mubr.msk.f32.mxu0 %vm64_vm0, %v41_v14  ;;  %1188 = vmatpush3.bf16.msra.mxu0 %v1185_v32 }
  0x16   :  { %1190 = vmatprep.subr.bf16.mxu0 %v1189_v34 }
  0x18   :  { %973 = vmatmul.mubr.msk.f32.gmra.mrb[2].mxu0 %vm64_vm0, %v42_v15 }
  0x19   :  { %975 = vmatprep.mubr.msk.f32.mxu0 %vm64_vm0, %v43_v16  ;;  %1192 = vmatpush3.bf16.msra.mxu0 %v1189_v34 }
  0x1c   :  { %976 = vmatmul.mubr.msk.f32.gmra.mrb[4].mxu0 %vm64_vm0, %v44_v17 }
  0x1d   :  { %978 = vmatprep.mubr.msk.f32.mxu0 %vm64_vm0, %v45_v18 }
  0x20   :  { %979 = vmatmul.mubr.msk.f32.gmra.mrb[6].mxu0 %vm64_vm0, %v46_v19 }
  0x21   :  { %981 = vmatprep.mubr.msk.f32.mxu0 %vm64_vm0, %v47_v20 }
  0x24   :  { %982 = vmatmul.mubr.msk.f32.gmra.mrb[8].mxu0 %vm64_vm0, %v48_v21 }
  0x25   :  { %984 = vmatprep.mubr.msk.f32.mxu0 %vm64_vm0, %v49_v22 }
  0x28   :  { %985 = vmatmul.mubr.msk.f32.gmra.mrb[10].mxu0 %vm64_vm0, %v50_v23 }
  0x29   :  { %987 = vmatprep.mubr.msk.f32.mxu0 %vm64_vm0, %v51_v24 }
  0x2c   :  { %988 = vmatmul.mubr.msk.f32.gmra.mrb[12].mxu0 %vm64_vm0, %v52_v25 }
  0x2d   :  { %990 = vmatprep.mubr.msk.f32.mxu0 %vm64_vm0, %v53_v26 }
  0x30   :  { %991 = vmatmul.mubr.msk.f32.gmra.mrb[14].mxu0 %vm64_vm0, %v54_v27 }
  0xe7   :  { %v971_v35 = vpop.f32.mrb[0].mxu0 }
  0xe8   :  { %v179_v36 = vpop.f32.mrb[1].mxu0 }
  0xe9   :  { %v1153_v37 = vpack.c.bf16 %v971_v35, %v179_v36 }
  0xeb   :  { %v974_v38 = vpop.f32.mrb[2].mxu0  ;;  %1154 = vmatprep.subr.bf16.mxu1 %v1153_v37 }
  0xec   :  { %v189_v39 = vpop.f32.mrb[3].mxu0  ;;  %1156 = vmatpush3.bf16.msra.mxu1 %v1153_v37 }
  0xed   :  { %v1157_v40 = vpack.c.bf16 %v974_v38, %v189_v39 }
  0xef   :  { %v977_v41 = vpop.f32.mrb[4].mxu0  ;;  %1158 = vmatprep.subr.bf16.mxu1 %v1157_v40 }
  0xf0   :  { %v199_v42 = vpop.f32.mrb[5].mxu0  ;;  %1160 = vmatpush3.bf16.msra.mxu1 %v1157_v40 }
  0xf1   :  { %v1161_v43 = vpack.c.bf16 %v977_v41, %v199_v42 }
  0xf3   :  { %v980_v44 = vpop.f32.mrb[6].mxu0  ;;  %1162 = vmatprep.subr.bf16.mxu1 %v1161_v43 }
  0xf4   :  { %v209_v45 = vpop.f32.mrb[7].mxu0  ;;  %1164 = vmatpush3.bf16.msra.mxu1 %v1161_v43 }
  0xf5   :  { %v1165_v46 = vpack.c.bf16 %v980_v44, %v209_v45 }
  0xf7   :  { %v983_v47 = vpop.f32.mrb[8].mxu0  ;;  %1166 = vmatprep.subr.bf16.mxu1 %v1165_v46 }
  0xf8   :  { %v219_v48 = vpop.f32.mrb[9].mxu0  ;;  %1168 = vmatpush3.bf16.msra.mxu1 %v1165_v46 }
  0xf9   :  { %v1169_v49 = vpack.c.bf16 %v983_v47, %v219_v48 }
  0xfb   :  { %v986_v50 = vpop.f32.mrb[10].mxu0  ;;  %1170 = vmatprep.subr.bf16.mxu1 %v1169_v49 }
  0xfc   :  { %v229_v51 = vpop.f32.mrb[11].mxu0  ;;  %1172 = vmatpush3.bf16.msra.mxu1 %v1169_v49 }
  0xfd   :  { %v1173_v52 = vpack.c.bf16 %v986_v50, %v229_v51 }
  0xff   :  { %v989_v53 = vpop.f32.mrb[12].mxu0  ;;  %1174 = vmatprep.subr.bf16.mxu1 %v1173_v52 }
 0x100   :  { %v239_v54 = vpop.f32.mrb[13].mxu0  ;;  %1176 = vmatpush3.bf16.msra.mxu1 %v1173_v52 }
 0x101   :  { %v1177_v55 = vpack.c.bf16 %v989_v53, %v239_v54 }
 0x103   :  { %v992_v56 = vpop.f32.mrb[14].mxu0  ;;  %1178 = vmatprep.subr.bf16.mxu1 %v1177_v55 }
 0x104   :  { %v249_v57 = vpop.f32.mrb[15].mxu0  ;;  %1180 = vmatpush3.bf16.msra.mxu1 %v1177_v55 }
 0x105   :  { %v1181_v58 = vpack.c.bf16 %v992_v56, %v249_v57 }
 0x107   :  { %1182 = vmatprep.subr.bf16.mxu1 %v1181_v58 }
 0x108   :  { %1184 = vmatpush3.bf16.msra.mxu1 %v1181_v58 }
 0x10b   :  { %1026 = vmatmul.mubr.f32.vlgmr.msra.gmra.mrb[0].mxu1 %v1385_v59 }
 0x10c   :  { %1028 = vmatprep.mubr.f32.mxu1 %v1390_v60 }
 0x10f   :  { %1029 = vmatmul.mubr.f32.gmra.mrb[2].mxu1 %v1397_v61 }
 0x110   :  { %1031 = vmatprep.mubr.f32.mxu1 %v27_v62 }
 0x113   :  { %1032 = vmatmul.mubr.f32.gmra.mrb[4].mxu1 %v1406_v63 }
 0x114   :  { %1034 = vmatprep.mubr.f32.mxu1 %v1411_v0 }
 0x117   :  { %1035 = vmatmul.mubr.f32.gmra.mrb[6].mxu1 %v1418_v1 }
 0x118   :  { %1037 = vmatprep.mubr.f32.mxu1 %v1423_v2 }
 0x11b   :  { %1038 = vmatmul.mubr.f32.gmra.mrb[8].mxu1 %v1430_v3 }
 0x11c   :  { %1040 = vmatprep.mubr.f32.mxu1 %v1435_v4 }
 0x11f   :  { %1041 = vmatmul.mubr.f32.gmra.mrb[10].mxu1 %v1442_v5 }
 0x120   :  { %1043 = vmatprep.mubr.f32.mxu1 %v1447_v6 }
 0x123   :  { %1044 = vmatmul.mubr.f32.gmra.mrb[12].mxu1 %v1454_v7 }
 0x124   :  { %1046 = vmatprep.mubr.f32.mxu1 %v1459_v8 }
 0x127   :  { %1047 = vmatmul.mubr.f32.gmra.mrb[14].mxu1 %v1466_v9 }
 0x128   :  { %1119 = vmatprep.mubr.f32.mxu1 %v27_v62 }
 0x1de   :  { %v1027_v11 = vpop.f32.mrb[0].mxu1 }
 0x1df   :  { %v336_v12 = vadd.f32 %v1027_v11, %v827_v10  ;;  %v330_v13 = vpop.f32.mrb[1].mxu1 }
 0x1e0   :  { %v331_v14 = vadd.f32 %v827_v10, %v330_v13 }
 0x1e1   :  { %v410_v17 = vmax.f32 %v336_v12, 0.0 }
 0x1e2   :  { %v409_v15 = vmax.f32 %v331_v14, 0.0  ;;  %v1030_v16 = vpop.f32.mrb[2].mxu1 }
 0x1e3   :  { %v346_v18 = vadd.f32 %v1030_v16, %v827_v10  ;;  %v340_v19 = vpop.f32.mrb[3].mxu1 }
 0x1e4   :  { %v341_v20 = vadd.f32 %v827_v10, %v340_v19  ;;  %1057 = vmatprep.mubr.msk.f32.mxu0 %vm430_vm1, %v409_v15 }
 0x1e5   :  { %1058 = vmatmul.mubr.msk.f32.vlgmr.msra.gmra.mrb[16].mxu0 %vm430_vm1, %v410_v17  ;;  %v412_v23 = vmax.f32 %v346_v18, 0.0 }
 0x1e6   :  { %v411_v21 = vmax.f32 %v341_v20, 0.0  ;;  %v1033_v22 = vpop.f32.mrb[4].mxu1 }
 0x1e7   :  { %v356_v24 = vadd.f32 %v1033_v22, %v827_v10  ;;  %v350_v25 = vpop.f32.mrb[5].mxu1 }
 0x1e8   :  { %v351_v26 = vadd.f32 %v827_v10, %v350_v25  ;;  %1060 = vmatprep.mubr.msk.f32.mxu0 %vm430_vm1, %v411_v21 }
 0x1e9   :  { %1061 = vmatmul.mubr.msk.f32.gmra.mrb[18].mxu0 %vm430_vm1, %v412_v23  ;;  %v414_v30 = vmax.f32 %v356_v24, 0.0 }
 0x1ea   :  { %v413_v27 = vmax.f32 %v351_v26, 0.0  ;;  %v1036_v29 = vpop.f32.mrb[6].mxu1 }
 0x1eb   :  { %v366_v31 = vadd.f32 %v1036_v29, %v827_v10  ;;  %v360_v32 = vpop.f32.mrb[7].mxu1 }
 0x1ec   :  { %v361_v33 = vadd.f32 %v827_v10, %v360_v32  ;;  %1063 = vmatprep.mubr.msk.f32.mxu0 %vm430_vm1, %v413_v27 }
 0x1ed   :  { %1064 = vmatmul.mubr.msk.f32.gmra.mrb[20].mxu0 %vm430_vm1, %v414_v30  ;;  %v416_v36 = vmax.f32 %v366_v31, 0.0 }
 0x1ee   :  { %v415_v34 = vmax.f32 %v361_v33, 0.0  ;;  %v1039_v35 = vpop.f32.mrb[8].mxu1 }
 0x1ef   :  { %v376_v37 = vadd.f32 %v1039_v35, %v827_v10  ;;  %v370_v38 = vpop.f32.mrb[9].mxu1 }
 0x1f0   :  { %v371_v39 = vadd.f32 %v827_v10, %v370_v38  ;;  %1066 = vmatprep.mubr.msk.f32.mxu0 %vm430_vm1, %v415_v34 }
 0x1f1   :  { %1067 = vmatmul.mubr.msk.f32.gmra.mrb[22].mxu0 %vm430_vm1, %v416_v36  ;;  %v418_v42 = vmax.f32 %v376_v37, 0.0 }
 0x1f2   :  { %v417_v40 = vmax.f32 %v371_v39, 0.0  ;;  %v1042_v41 = vpop.f32.mrb[10].mxu1 }
 0x1f3   :  { %v386_v43 = vadd.f32 %v1042_v41, %v827_v10  ;;  %v380_v44 = vpop.f32.mrb[11].mxu1 }
 0x1f4   :  { %v381_v45 = vadd.f32 %v827_v10, %v380_v44  ;;  %1069 = vmatprep.mubr.msk.f32.mxu0 %vm430_vm1, %v417_v40 }
 0x1f5   :  { %1070 = vmatmul.mubr.msk.f32.gmra.mrb[24].mxu0 %vm430_vm1, %v418_v42  ;;  %v420_v48 = vmax.f32 %v386_v43, 0.0 }
 0x1f6   :  { %v419_v46 = vmax.f32 %v381_v45, 0.0  ;;  %v1045_v47 = vpop.f32.mrb[12].mxu1 }
 0x1f7   :  { %v396_v49 = vadd.f32 %v1045_v47, %v827_v10  ;;  %v390_v50 = vpop.f32.mrb[13].mxu1 }
 0x1f8   :  { %v391_v51 = vadd.f32 %v827_v10, %v390_v50  ;;  %1072 = vmatprep.mubr.msk.f32.mxu0 %vm430_vm1, %v419_v46 }
 0x1f9   :  { %1073 = vmatmul.mubr.msk.f32.gmra.mrb[26].mxu0 %vm430_vm1, %v420_v48  ;;  %v422_v54 = vmax.f32 %v396_v49, 0.0 }
 0x1fa   :  { %v421_v52 = vmax.f32 %v391_v51, 0.0  ;;  %v1048_v53 = vpop.f32.mrb[14].mxu1 }
 0x1fb   :  { %v406_v55 = vadd.f32 %v1048_v53, %v827_v10  ;;  %v400_v56 = vpop.f32.mrb[15].mxu1 }
 0x1fc   :  { %v401_v57 = vadd.f32 %v827_v10, %v400_v56  ;;  %1075 = vmatprep.mubr.msk.f32.mxu0 %vm430_vm1, %v421_v52 }
 0x1fd   :  { %1076 = vmatmul.mubr.msk.f32.gmra.mrb[28].mxu0 %vm430_vm1, %v422_v54  ;;  %v424_v62 = vmax.f32 %v406_v55, 0.0 }
 0x1fe   :  { %v423_v58 = vmax.f32 %v401_v57, 0.0 }
 0x200   :  { %1078 = vmatprep.mubr.msk.f32.mxu0 %vm430_vm1, %v423_v58 }
 0x201   :  { %1079 = vmatmul.mubr.msk.f32.gmra.mrb[30].mxu0 %vm430_vm1, %v424_v62 }
 0x202   :  { %1113 = vmatprep.mubr.f32.mxu0 %v1367_v28 }
 0x2b8   :  { %v1059_v11 = vpop.f32.mrb[16].mxu0 }
 0x2b9   :  { %v545_v12 = vpop.f32.mrb[17].mxu0 }
 0x2ba   :  { %v1193_v13 = vpack.c.bf16 %v1059_v11, %v545_v12 }
 0x2bc   :  { %v1062_v14 = vpop.f32.mrb[18].mxu0  ;;  %1194 = vmatprep.subr.bf16.mxu0 %v1193_v13  ;;  %1225 = vmatprep.subr.bf16.mxu1 %v1193_v13 }
 0x2bd   :  { %v555_v15 = vpop.f32.mrb[19].mxu0  ;;  %1196 = vmatpush3.bf16.msra.mxu0 %v1193_v13  ;;  %1233 = vmatpush3.bf16.msra.mxu1 %v1193_v13 }
 0x2be   :  { %v1197_v10 = vpack.c.bf16 %v1062_v14, %v555_v15 }
 0x2c0   :  { %v1065_v16 = vpop.f32.mrb[20].mxu0  ;;  %1198 = vmatprep.subr.bf16.mxu0 %v1197_v10  ;;  %1226 = vmatprep.subr.bf16.mxu1 %v1197_v10 }
 0x2c1   :  { %v565_v17 = vpop.f32.mrb[21].mxu0  ;;  %1200 = vmatpush3.bf16.msra.mxu0 %v1197_v10  ;;  %1234 = vmatpush3.bf16.msra.mxu1 %v1197_v10 }
 0x2c2   :  { %v1201_v18 = vpack.c.bf16 %v1065_v16, %v565_v17 }
 0x2c4   :  { %v1068_v19 = vpop.f32.mrb[22].mxu0  ;;  %1202 = vmatprep.subr.bf16.mxu0 %v1201_v18  ;;  %1227 = vmatprep.subr.bf16.mxu1 %v1201_v18 }
 0x2c5   :  { %v575_v28 = vpop.f32.mrb[23].mxu0  ;;  %1204 = vmatpush3.bf16.msra.mxu0 %v1201_v18  ;;  %1235 = vmatpush3.bf16.msra.mxu1 %v1201_v18 }
 0x2c6   :  { %v1205_v20 = vpack.c.bf16 %v1068_v19, %v575_v28 }
 0x2c8   :  { %v1071_v21 = vpop.f32.mrb[24].mxu0  ;;  %1206 = vmatprep.subr.bf16.mxu0 %v1205_v20  ;;  %1228 = vmatprep.subr.bf16.mxu1 %v1205_v20 }
 0x2c9   :  { %v585_v22 = vpop.f32.mrb[25].mxu0  ;;  %1208 = vmatpush3.bf16.msra.mxu0 %v1205_v20  ;;  %1236 = vmatpush3.bf16.msra.mxu1 %v1205_v20 }
 0x2ca   :  { %v1209_v23 = vpack.c.bf16 %v1071_v21, %v585_v22 }
 0x2cc   :  { %v1074_v24 = vpop.f32.mrb[26].mxu0  ;;  %1210 = vmatprep.subr.bf16.mxu0 %v1209_v23  ;;  %1229 = vmatprep.subr.bf16.mxu1 %v1209_v23 }
 0x2cd   :  { %v595_v25 = vpop.f32.mrb[27].mxu0  ;;  %1212 = vmatpush3.bf16.msra.mxu0 %v1209_v23  ;;  %1237 = vmatpush3.bf16.msra.mxu1 %v1209_v23 }
 0x2ce   :  { %v1213_v26 = vpack.c.bf16 %v1074_v24, %v595_v25 }
 0x2d0   :  { %v1077_v27 = vpop.f32.mrb[28].mxu0  ;;  %1214 = vmatprep.subr.bf16.mxu0 %v1213_v26  ;;  %1230 = vmatprep.subr.bf16.mxu1 %v1213_v26 }
 0x2d1   :  { %v605_v29 = vpop.f32.mrb[29].mxu0  ;;  %1216 = vmatpush3.bf16.msra.mxu0 %v1213_v26  ;;  %1238 = vmatpush3.bf16.msra.mxu1 %v1213_v26 }
 0x2d2   :  { %v1217_v30 = vpack.c.bf16 %v1077_v27, %v605_v29 }
 0x2d4   :  { %v1080_v31 = vpop.f32.mrb[30].mxu0  ;;  %1218 = vmatprep.subr.bf16.mxu0 %v1217_v30  ;;  %1231 = vmatprep.subr.bf16.mxu1 %v1217_v30 }
 0x2d5   :  { %v615_v32 = vpop.f32.mrb[31].mxu0  ;;  %1220 = vmatpush3.bf16.msra.mxu0 %v1217_v30  ;;  %1239 = vmatpush3.bf16.msra.mxu1 %v1217_v30 }
 0x2d6   :  { %v1221_v33 = vpack.c.bf16 %v1080_v31, %v615_v32 }
 0x2d8   :  { %1222 = vmatprep.subr.bf16.mxu0 %v1221_v33  ;;  %1232 = vmatprep.subr.bf16.mxu1 %v1221_v33 }
 0x2d9   :  { %1224 = vmatpush3.bf16.msra.mxu0 %v1221_v33  ;;  %1240 = vmatpush3.bf16.msra.mxu1 %v1221_v33 }
 0x2dc   :  { %1120 = vmatmul.mubr.f32.vlgmr.msra.gmra.mrb[16].mxu1 %v1406_v63  ;;  %1114 = vmatmul.mubr.f32.vlgmr.msra.gmra.mrb[32].mxu0 %v1385_v59  ;;  %v844_v59 = vld [vmem:[%s1575_s5] ss:$0 sm:$0xff] }
 0x2dd   :  { %1122 = vmatprep.mubr.f32.mxu1 %v1411_v0  ;;  %1116 = vmatprep.mubr.f32.mxu0 %v1390_v60 }
 0x2e0   :  { %1123 = vmatmul.mubr.f32.gmra.mrb[18].mxu1 %v1418_v1  ;;  %1117 = vmatmul.mubr.f32.gmra.mrb[34].mxu0 %v1397_v61 }
 0x2e1   :  { %1125 = vmatprep.mubr.f32.mxu1 %v1423_v2 }
 0x2e4   :  { %1126 = vmatmul.mubr.f32.gmra.mrb[20].mxu1 %v1430_v3 }
 0x2e5   :  { %1128 = vmatprep.mubr.f32.mxu1 %v1435_v4 }
 0x2e8   :  { %1129 = vmatmul.mubr.f32.gmra.mrb[22].mxu1 %v1442_v5 }
 0x2e9   :  { %1131 = vmatprep.mubr.f32.mxu1 %v1447_v6 }
 0x2ec   :  { %1132 = vmatmul.mubr.f32.gmra.mrb[24].mxu1 %v1454_v7 }
 0x2ed   :  { %1134 = vmatprep.mubr.f32.mxu1 %v1459_v8 }
 0x2f0   :  { %1135 = vmatmul.mubr.f32.gmra.mrb[26].mxu1 %v1466_v9 }
 0x3af   :  { %v1121_v60 = vpop.f32.mrb[16].mxu1  ;;  %v1115_v61 = vpop.f32.mrb[32].mxu0 }
 0x3b0   :  { %v722_v63 = vadd.f32 %v1121_v60, %v844_v59  ;;  %v716_v0 = vpop.f32.mrb[17].mxu1  ;;  %v702_v1 = vadd.f32 %v1115_v61, %v844_v59  ;;  %v696_v2 = vpop.f32.mrb[33].mxu0 }
 0x3b1   :  { %v717_v3 = vadd.f32 %v844_v59, %v716_v0  ;;  %v697_v4 = vadd.f32 %v844_v59, %v696_v2 }
 0x3b2   :  { %v780_v5 = vmax.f32 %v722_v63, 0.0  ;;  %v776_v6 = vmax.f32 %v702_v1, 0.0 }
 0x3b3   :  { %v779_v34 = vmax.f32 %v717_v3, 0.0  ;;  %v1124_v7 = vpop.f32.mrb[18].mxu1  ;;  %v775_v35 = vmax.f32 %v697_v4, 0.0  ;;  %v1118_v8 = vpop.f32.mrb[34].mxu0 }
 0x3b4   :  { %796 = vst.msk [vmem:[%s1576_s6 + $0x28] sm:$0xff] %vm430_vm1, %v780_v5  ;;  %v732_v9 = vadd.f32 %v1124_v7, %v844_v59  ;;  %v726_v36 = vpop.f32.mrb[19].mxu1  ;;  %792 = vst.msk [vmem:[%s1576_s6 + $0x8] sm:$0xff] %vm430_vm1, %v776_v6  ;;  %v712_v37 = vadd.f32 %v1118_v8, %v844_v59  ;;  %v706_v38 = vpop.f32.mrb[35].mxu0 }
 0x3b5   :  { %795 = vst.msk [vmem:[%s1576_s6 + $0x20] sm:$0xff] %vm430_vm1, %v779_v34  ;;  %v727_v39 = vadd.f32 %v844_v59, %v726_v36  ;;  %791 = vst.msk [vmem:[%s1576_s6] sm:$0xff] %vm430_vm1, %v775_v35  ;;  %v707_v40 = vadd.f32 %v844_v59, %v706_v38 }
 0x3b6   :  { %v782_v41 = vmax.f32 %v732_v9, 0.0  ;;  %v778_v42 = vmax.f32 %v712_v37, 0.0 }
 0x3b7   :  { %v781_v43 = vmax.f32 %v727_v39, 0.0  ;;  %v1127_v44 = vpop.f32.mrb[20].mxu1  ;;  %v777_v45 = vmax.f32 %v707_v40, 0.0 }
 0x3b8   :  { %798 = vst.msk [vmem:[%s1576_s6 + $0x38] sm:$0xff] %vm430_vm1, %v782_v41  ;;  %v742_v46 = vadd.f32 %v1127_v44, %v844_v59  ;;  %v736_v47 = vpop.f32.mrb[21].mxu1  ;;  %794 = vst.msk [vmem:[%s1576_s6 + $0x18] sm:$0xff] %vm430_vm1, %v778_v42 }
 0x3b9   :  { %797 = vst.msk [vmem:[%s1576_s6 + $0x30] sm:$0xff] %vm430_vm1, %v781_v43  ;;  %v737_v48 = vadd.f32 %v844_v59, %v736_v47  ;;  %793 = vst.msk [vmem:[%s1576_s6 + $0x10] sm:$0xff] %vm430_vm1, %v777_v45 }
 0x3ba   :  { %v784_v49 = vmax.f32 %v742_v46, 0.0 }
 0x3bb   :  { %v783_v50 = vmax.f32 %v737_v48, 0.0  ;;  %v1130_v51 = vpop.f32.mrb[22].mxu1 }
 0x3bc   :  { %800 = vst.msk [vmem:[%s1576_s6 + $0x48] sm:$0xff] %vm430_vm1, %v784_v49  ;;  %v752_v52 = vadd.f32 %v1130_v51, %v844_v59  ;;  %v746_v53 = vpop.f32.mrb[23].mxu1 }
 0x3bd   :  { %799 = vst.msk [vmem:[%s1576_s6 + $0x40] sm:$0xff] %vm430_vm1, %v783_v50  ;;  %v747_v54 = vadd.f32 %v844_v59, %v746_v53 }
 0x3be   :  { %v786_v55 = vmax.f32 %v752_v52, 0.0 }
 0x3bf   :  { %v785_v56 = vmax.f32 %v747_v54, 0.0  ;;  %v1133_v57 = vpop.f32.mrb[24].mxu1 }
 0x3c0   :  { %802 = vst.msk [vmem:[%s1576_s6 + $0x58] sm:$0xff] %vm430_vm1, %v786_v55  ;;  %v762_v58 = vadd.f32 %v1133_v57, %v844_v59  ;;  %v756_v62 = vpop.f32.mrb[25].mxu1 }
 0x3c1   :  { %801 = vst.msk [vmem:[%s1576_s6 + $0x50] sm:$0xff] %vm430_vm1, %v785_v56  ;;  %v757_v11 = vadd.f32 %v844_v59, %v756_v62 }
 0x3c2   :  { %v788_v12 = vmax.f32 %v762_v58, 0.0 }
 0x3c3   :  { %v787_v13 = vmax.f32 %v757_v11, 0.0  ;;  %v1136_v14 = vpop.f32.mrb[26].mxu1 }
 0x3c4   :  { %804 = vst.msk [vmem:[%s1576_s6 + $0x68] sm:$0xff] %vm430_vm1, %v788_v12  ;;  %v772_v15 = vadd.f32 %v1136_v14, %v844_v59  ;;  %v766_v10 = vpop.f32.mrb[27].mxu1 }
 0x3c5   :  { %803 = vst.msk [vmem:[%s1576_s6 + $0x60] sm:$0xff] %vm430_vm1, %v787_v13  ;;  %v767_v16 = vadd.f32 %v844_v59, %v766_v10 }
 0x3c6   :  { %v790_v17 = vmax.f32 %v772_v15, 0.0 }
 0x3c7   :  { %v789_v18 = vmax.f32 %v767_v16, 0.0 }
 0x3c8   :  { %806 = vst.msk [vmem:[%s1576_s6 + $0x78] sm:$0xff] %vm430_vm1, %v790_v17 }
 0x3c9   :  { %805 = vst.msk [vmem:[%s1576_s6 + $0x70] sm:$0xff] %vm430_vm1, %v789_v18 }

</bundles_post_ra>
